<compile_context>
chip_gen: v7x
topology: tpu7x:2x2x1
jax: 0.10.0
libtpu: 0.0.40
codegen_flags: <defaults>
</compile_context>

<pallas_src>
import functools

import jax
import jax.numpy as jnp
from jax import lax
from jax.experimental import pallas as pl
from jax.experimental.pallas import tpu as pltpu


def _resnet_block_kernel(x_ref, w1_ref, b1_ref, w2_ref, b2_ref, o_ref, im_ref,
                         *, H, W, eps):
    C = x_ref.shape[1]
    HW = H * W
    inv_hw = 1.0 / HW

    # Lane-index masks used for the reflection-padding boundary fixups.
    lane = lax.broadcasted_iota(jnp.int32, (1, HW), 1)
    if W & (W - 1) == 0:                       # power-of-two width: cheap AND
        col = jnp.bitwise_and(lane, W - 1)
    else:
        col = lane % W
    top = lane < W                             # output row 0
    bot = lane >= HW - W                       # output row H-1
    left = col == 0                            # output col 0
    right = col == W - 1                       # output col W-1

    def taps(a, step, lo_mask, hi_mask):
        """Source offsets -step/+step (flat lanes) with edge reflection.

        pltpu.roll follows jnp.roll semantics: roll(a, s, 1)[p] == a[(p-s) % HW],
        so `minus[p] = a[p-step]`, `plus[p] = a[p+step]`.  At the low edge the
        -step source reflects onto the +step source (and vice versa).
        """
        minus = pltpu.roll(a, step, axis=1)
        plus = pltpu.roll(a, HW - step, axis=1)
        lo = jnp.where(lo_mask, plus, minus)   # tap at offset -step
        hi = jnp.where(hi_mask, minus, plus)   # tap at offset +step
        return lo, hi

    def conv3x3(a, w_ref, b_ref):
        """Reflection-padded 3x3 conv of a [C, HW] f32 map as one MXU matmul."""
        v_lo, v_hi = taps(a, W, top, bot)                    # dy = 0 / 2
        verts = (v_lo, a, v_hi)                              # dy = 0, 1, 2
        for dy in range(3):
            h_lo, h_hi = taps(verts[dy], 1, left, right)     # dx = 0 / 2
            # im2col row order: dx-major, then dy, then input channel — matches
            # the wrapper's weight packing.
            im_ref[pl.ds((0 * 3 + dy) * C, C), :] = h_lo
            im_ref[pl.ds((1 * 3 + dy) * C, C), :] = verts[dy]
            im_ref[pl.ds((2 * 3 + dy) * C, C), :] = h_hi
        out = jnp.dot(w_ref[...], im_ref[...],               # [C,9C] x [9C,HW]
                      preferred_element_type=jnp.float32)
        return out + b_ref[...]                              # bias [C,1] broadcasts on lanes

    def instance_norm(a):
        """Per-channel IN over lanes, one-pass f32 stats (biased variance)."""
        s1 = jnp.sum(a, axis=1, keepdims=True)
        s2 = jnp.sum(a * a, axis=1, keepdims=True)
        m = s1 * inv_hw
        v = jnp.maximum(s2 * inv_hw - m * m, 0.0)
        return (a - m) * lax.rsqrt(v + eps)

    h = conv3x3(x_ref[0].astype(jnp.float32), w1_ref, b1_ref)
    h = jnp.maximum(instance_norm(h), 0.0)                   # ReLU
    h = instance_norm(conv3x3(h, w2_ref, b2_ref))
    # Residual: re-read x from VMEM (keeps no long-lived f32 input copy).
    o_ref[0] = (x_ref[0].astype(jnp.float32) + h).astype(o_ref.dtype)


def resnet_block(x, w1, b1, w2, b2, eps=1e-5):
    """ResnetBlock.forward.

    x        : [B, C, H, W]  (NCHW, like PyTorch)
    w1, w2   : [C, C, 3, 3]  (OIHW conv weights)
    b1, b2   : [C] or None   (use_bias=False)
    """
    B, C, H, W = x.shape
    HW = H * W

    # Free, contiguous collapse [B,C,H,W] -> [B,C,H*W]: no transpose, no copy.
    x_flat = x.reshape(B, C, HW)

    def pack_w(w):
        # [C_out, C_in, kh, kw] -> [C_out, kw*3C + kh*C + c_in], matching the
        # kernel's im2col row order (dx-major, then dy, then input channel).
        return jnp.transpose(w, (0, 3, 2, 1)).reshape(C, 9 * C).astype(jnp.float32)

    def pack_b(b):
        bv = jnp.zeros((C,), jnp.float32) if b is None else b.astype(jnp.float32)
        return bv.reshape(C, 1)

    w1m, w2m = pack_w(w1), pack_w(w2)
    b1m, b2m = pack_b(b1), pack_b(b2)

    kernel = functools.partial(_resnet_block_kernel, H=H, W=W, eps=float(eps))
    out_flat = pl.pallas_call(
        kernel,
        grid=(B,),
        in_specs=[
            pl.BlockSpec((1, C, HW), lambda b: (b, 0, 0)),    # per-image tile
            pl.BlockSpec((C, 9 * C), lambda b: (0, 0)),       # resident weights
            pl.BlockSpec((C, 1), lambda b: (0, 0)),
            pl.BlockSpec((C, 9 * C), lambda b: (0, 0)),
            pl.BlockSpec((C, 1), lambda b: (0, 0)),
        ],
        out_specs=pl.BlockSpec((1, C, HW), lambda b: (b, 0, 0)),
        out_shape=jax.ShapeDtypeStruct((B, C, HW), x.dtype),
        scratch_shapes=[pltpu.VMEM((9 * C, HW), jnp.float32)],  # im2col, reused by both convs
        compiler_params=pltpu.CompilerParams(
            dimension_semantics=("parallel",)),
    )(x_flat, w1m, b1m, w2m, b2m)
    return out_flat.reshape(B, C, H, W)


def _resnet_block_ref(x, w1, b1, w2, b2, eps=1e-5):
    """Pure-JAX reference mirroring the PyTorch ResnetBlock."""
    def conv(a, w, b):
        a = jnp.pad(a, ((0, 0), (0, 0), (1, 1), (1, 1)), mode="reflect")
        out = lax.conv_general_dilated(
            a, w, window_strides=(1, 1), padding="VALID",
            dimension_numbers=("NCHW", "OIHW", "NCHW"),
            precision=lax.Precision.HIGHEST)
        if b is not None:
            out = out + b[None, :, None, None]
        return out

    def inorm(a):
        m = a.mean(axis=(2, 3), keepdims=True)
        v = ((a - m) ** 2).mean(axis=(2, 3), keepdims=True)
        return (a - m) / jnp.sqrt(v + eps)

    h = jnp.maximum(inorm(conv(x, w1, b1)), 0.0)
    h = inorm(conv(h, w2, b2))
    return x + h


if __name__ == "__main__":
    key = jax.random.PRNGKey(0)
    kx, kw1, kb1, kw2, kb2 = jax.random.split(key, 5)

    B, C, H, W = 2, 4, 16, 16          # ResnetBlock(dim=4, use_bias=True)
    x = jax.random.normal(kx, (B, C, H, W), dtype=jnp.float32)
    scale = 1.0 / (9 * C) ** 0.5
    w1 = jax.random.normal(kw1, (C, C, 3, 3), dtype=jnp.float32) * scale
    b1 = jax.random.normal(kb1, (C,), dtype=jnp.float32) * 0.1
    w2 = jax.random.normal(kw2, (C, C, 3, 3), dtype=jnp.float32) * scale
    b2 = jax.random.normal(kb2, (C,), dtype=jnp.float32) * 0.1

    out = jax.block_until_ready(resnet_block(x, w1, b1, w2, b2))
    ref = _resnet_block_ref(x, w1, b1, w2, b2)

    assert out.shape == x.shape
    max_err = float(jnp.max(jnp.abs(out - ref)))
    assert jnp.allclose(out, ref, atol=1e-2, rtol=1e-2), f"max_err={max_err}"
    print("KERNEL_OK")
</pallas_src>

<mosaic_0001>
module attributes {stable_mosaic.version = 11 : i64} {
  func.func @_resnet_block_kernel(%arg0: i32, %arg1: memref<1x4x256xf32, #tpu.memory_space<vmem>>, %arg2: memref<4x36xf32, #tpu.memory_space<vmem>>, %arg3: memref<4x1xf32, #tpu.memory_space<vmem>>, %arg4: memref<4x36xf32, #tpu.memory_space<vmem>>, %arg5: memref<4x1xf32, #tpu.memory_space<vmem>>, %arg6: memref<1x4x256xf32, #tpu.memory_space<vmem>>, %arg7: memref<36x256xf32, #tpu.memory_space<vmem>>) attributes {dimension_semantics = [#tpu.dimension_semantics<parallel>], iteration_bounds = array<i64: 2>, scalar_prefetch = 0 : i64, scratch_operands = 1 : i64, tpu.core_type = #tpu.core_type<tc>, window_params = [{transform_indices = @transform_0, window_bounds = array<i64: 1, 4, 256>}, {pipeline_mode = #tpu.pipeline_mode<synchronous>, transform_indices = @transform_1, window_bounds = array<i64: 4, 36>}, {pipeline_mode = #tpu.pipeline_mode<synchronous>, transform_indices = @transform_2, window_bounds = array<i64: 4, 1>}, {pipeline_mode = #tpu.pipeline_mode<synchronous>, transform_indices = @transform_3, window_bounds = array<i64: 4, 36>}, {pipeline_mode = #tpu.pipeline_mode<synchronous>, transform_indices = @transform_4, window_bounds = array<i64: 4, 1>}, {transform_indices = @transform_5, window_bounds = array<i64: 1, 4, 256>}]} {
    %0 = tpu.iota {dimensions = array<i32: 1>} : vector<1x256xi32>
    %c15_i32 = arith.constant 15 : i32
    %1 = vector.broadcast %c15_i32 : i32 to vector<1x256xi32>
    %2 = arith.andi %0, %1 : vector<1x256xi32>
    %c16_i32 = arith.constant 16 : i32
    %3 = vector.broadcast %c16_i32 : i32 to vector<1x256xi32>
    %4 = arith.cmpi slt, %0, %3 : vector<1x256xi32>
    %c240_i32 = arith.constant 240 : i32
    %5 = vector.broadcast %c240_i32 : i32 to vector<1x256xi32>
    %6 = arith.cmpi sge, %0, %5 : vector<1x256xi32>
    %c0_i32 = arith.constant 0 : i32
    %7 = vector.broadcast %c0_i32 : i32 to vector<1x256xi32>
    %8 = arith.cmpi eq, %2, %7 : vector<1x256xi32>
    %c15_i32_0 = arith.constant 15 : i32
    %9 = vector.broadcast %c15_i32_0 : i32 to vector<1x256xi32>
    %10 = arith.cmpi eq, %2, %9 : vector<1x256xi32>
    %c0 = arith.constant 0 : index
    %c0_1 = arith.constant 0 : index
    %c0_2 = arith.constant 0 : index
    %11 = vector.load %arg1[%c0, %c0_1, %c0_2] : memref<1x4x256xf32, #tpu.memory_space<vmem>>, vector<1x4x256xf32>
    %12 = vector.shape_cast %11 : vector<1x4x256xf32> to vector<4x256xf32>
    %c16_i32_3 = arith.constant 16 : i32
    %13 = tpu.dynamic_rotate %12 by %c16_i32_3 dim 1 : vector<4x256xf32>, i32 -> vector<4x256xf32>
    %c240_i32_4 = arith.constant 240 : i32
    %14 = tpu.dynamic_rotate %12 by %c240_i32_4 dim 1 : vector<4x256xf32>, i32 -> vector<4x256xf32>
    %15 = vector.shape_cast %4 : vector<1x256xi1> to vector<1x256xi1>
    %16 = vector.broadcast %15 : vector<1x256xi1> to vector<4x256xi1>
    %17 = arith.select %16, %14, %13 : vector<4x256xi1>, vector<4x256xf32>
    %18 = vector.shape_cast %6 : vector<1x256xi1> to vector<1x256xi1>
    %19 = vector.broadcast %18 : vector<1x256xi1> to vector<4x256xi1>
    %20 = arith.select %19, %13, %14 : vector<4x256xi1>, vector<4x256xf32>
    %c1_i32 = arith.constant 1 : i32
    %21 = tpu.dynamic_rotate %17 by %c1_i32 dim 1 : vector<4x256xf32>, i32 -> vector<4x256xf32>
    %c255_i32 = arith.constant 255 : i32
    %22 = tpu.dynamic_rotate %17 by %c255_i32 dim 1 : vector<4x256xf32>, i32 -> vector<4x256xf32>
    %23 = vector.shape_cast %8 : vector<1x256xi1> to vector<1x256xi1>
    %24 = vector.broadcast %23 : vector<1x256xi1> to vector<4x256xi1>
    %25 = arith.select %24, %22, %21 : vector<4x256xi1>, vector<4x256xf32>
    %26 = vector.shape_cast %10 : vector<1x256xi1> to vector<1x256xi1>
    %27 = vector.broadcast %26 : vector<1x256xi1> to vector<4x256xi1>
    %28 = arith.select %27, %21, %22 : vector<4x256xi1>, vector<4x256xf32>
    %c0_5 = arith.constant 0 : index
    %c0_6 = arith.constant 0 : index
    %29 = vector.load %arg7[%c0_5, %c0_6] : memref<36x256xf32, #tpu.memory_space<vmem>>, vector<4x256xf32>
    tpu.vector_store %arg7[%c0_5, %c0_6], %25 {strides = array<i32>} : memref<36x256xf32, #tpu.memory_space<vmem>>, vector<4x256xf32>,
    %c12 = arith.constant 12 : index
    %c0_7 = arith.constant 0 : index
    %30 = vector.load %arg7[%c12, %c0_7] : memref<36x256xf32, #tpu.memory_space<vmem>>, vector<4x256xf32>
    tpu.vector_store %arg7[%c12, %c0_7], %17 {strides = array<i32>} : memref<36x256xf32, #tpu.memory_space<vmem>>, vector<4x256xf32>,
    %c24 = arith.constant 24 : index
    %c0_8 = arith.constant 0 : index
    %31 = vector.load %arg7[%c24, %c0_8] : memref<36x256xf32, #tpu.memory_space<vmem>>, vector<4x256xf32>
    tpu.vector_store %arg7[%c24, %c0_8], %28 {strides = array<i32>} : memref<36x256xf32, #tpu.memory_space<vmem>>, vector<4x256xf32>,
    %c1_i32_9 = arith.constant 1 : i32
    %32 = tpu.dynamic_rotate %12 by %c1_i32_9 dim 1 : vector<4x256xf32>, i32 -> vector<4x256xf32>
    %c255_i32_10 = arith.constant 255 : i32
    %33 = tpu.dynamic_rotate %12 by %c255_i32_10 dim 1 : vector<4x256xf32>, i32 -> vector<4x256xf32>
    %34 = vector.shape_cast %8 : vector<1x256xi1> to vector<1x256xi1>
    %35 = vector.broadcast %34 : vector<1x256xi1> to vector<4x256xi1>
    %36 = arith.select %35, %33, %32 : vector<4x256xi1>, vector<4x256xf32>
    %37 = vector.shape_cast %10 : vector<1x256xi1> to vector<1x256xi1>
    %38 = vector.broadcast %37 : vector<1x256xi1> to vector<4x256xi1>
    %39 = arith.select %38, %32, %33 : vector<4x256xi1>, vector<4x256xf32>
    %c4 = arith.constant 4 : index
    %c0_11 = arith.constant 0 : index
    %40 = vector.load %arg7[%c4, %c0_11] : memref<36x256xf32, #tpu.memory_space<vmem>>, vector<4x256xf32>
    tpu.vector_store %arg7[%c4, %c0_11], %36 {strides = array<i32>} : memref<36x256xf32, #tpu.memory_space<vmem>>, vector<4x256xf32>,
    %c16 = arith.constant 16 : index
    %c0_12 = arith.constant 0 : index
    %41 = vector.load %arg7[%c16, %c0_12] : memref<36x256xf32, #tpu.memory_space<vmem>>, vector<4x256xf32>
    tpu.vector_store %arg7[%c16, %c0_12], %12 {strides = array<i32>} : memref<36x256xf32, #tpu.memory_space<vmem>>, vector<4x256xf32>,
    %c28 = arith.constant 28 : index
    %c0_13 = arith.constant 0 : index
    %42 = vector.load %arg7[%c28, %c0_13] : memref<36x256xf32, #tpu.memory_space<vmem>>, vector<4x256xf32>
    tpu.vector_store %arg7[%c28, %c0_13], %39 {strides = array<i32>} : memref<36x256xf32, #tpu.memory_space<vmem>>, vector<4x256xf32>,
    %c1_i32_14 = arith.constant 1 : i32
    %43 = tpu.dynamic_rotate %20 by %c1_i32_14 dim 1 : vector<4x256xf32>, i32 -> vector<4x256xf32>
    %c255_i32_15 = arith.constant 255 : i32
    %44 = tpu.dynamic_rotate %20 by %c255_i32_15 dim 1 : vector<4x256xf32>, i32 -> vector<4x256xf32>
    %45 = vector.shape_cast %8 : vector<1x256xi1> to vector<1x256xi1>
    %46 = vector.broadcast %45 : vector<1x256xi1> to vector<4x256xi1>
    %47 = arith.select %46, %44, %43 : vector<4x256xi1>, vector<4x256xf32>
    %48 = vector.shape_cast %10 : vector<1x256xi1> to vector<1x256xi1>
    %49 = vector.broadcast %48 : vector<1x256xi1> to vector<4x256xi1>
    %50 = arith.select %49, %43, %44 : vector<4x256xi1>, vector<4x256xf32>
    %c8 = arith.constant 8 : index
    %c0_16 = arith.constant 0 : index
    %51 = vector.load %arg7[%c8, %c0_16] : memref<36x256xf32, #tpu.memory_space<vmem>>, vector<4x256xf32>
    tpu.vector_store %arg7[%c8, %c0_16], %47 {strides = array<i32>} : memref<36x256xf32, #tpu.memory_space<vmem>>, vector<4x256xf32>,
    %c20 = arith.constant 20 : index
    %c0_17 = arith.constant 0 : index
    %52 = vector.load %arg7[%c20, %c0_17] : memref<36x256xf32, #tpu.memory_space<vmem>>, vector<4x256xf32>
    tpu.vector_store %arg7[%c20, %c0_17], %20 {strides = array<i32>} : memref<36x256xf32, #tpu.memory_space<vmem>>, vector<4x256xf32>,
    %c32 = arith.constant 32 : index
    %c0_18 = arith.constant 0 : index
    %53 = vector.load %arg7[%c32, %c0_18] : memref<36x256xf32, #tpu.memory_space<vmem>>, vector<4x256xf32>
    tpu.vector_store %arg7[%c32, %c0_18], %50 {strides = array<i32>} : memref<36x256xf32, #tpu.memory_space<vmem>>, vector<4x256xf32>,
    %c0_19 = arith.constant 0 : index
    %c0_20 = arith.constant 0 : index
    %54 = vector.load %arg2[%c0_19, %c0_20] : memref<4x36xf32, #tpu.memory_space<vmem>>, vector<4x36xf32>
    %c0_21 = arith.constant 0 : index
    %c0_22 = arith.constant 0 : index
    %55 = vector.load %arg7[%c0_21, %c0_22] : memref<36x256xf32, #tpu.memory_space<vmem>>, vector<36x256xf32>
    %cst = arith.constant dense<0.000000e+00> : vector<4x256xf32>
    %56 = tpu.matmul %54, %55, %cst {dimension_numbers = #tpu.dot_dimension_numbers<[1], [0], [0], [1], [0, 0, 1, 1], [], []>} : vector<4x36xf32>, vector<36x256xf32>, vector<4x256xf32> -> vector<4x256xf32>
    %c0_23 = arith.constant 0 : index
    %c0_24 = arith.constant 0 : index
    %57 = vector.load %arg3[%c0_23, %c0_24] : memref<4x1xf32, #tpu.memory_space<vmem>>, vector<4x1xf32>
    %58 = vector.broadcast %57 : vector<4x1xf32> to vector<4x256xf32>
    %59 = arith.addf %56, %58 : vector<4x256xf32>
    %cst_25 = arith.constant dense<0.000000e+00> : vector<4xf32>
    %60 = vector.multi_reduction <add>, %59, %cst_25 [1] : vector<4x256xf32> to vector<4xf32>
    %61 = vector.shape_cast %60 : vector<4xf32> to vector<4x1xf32>
    %62 = arith.mulf %59, %59 : vector<4x256xf32>
    %cst_26 = arith.constant dense<0.000000e+00> : vector<4xf32>
    %63 = vector.multi_reduction <add>, %62, %cst_26 [1] : vector<4x256xf32> to vector<4xf32>
    %64 = vector.shape_cast %63 : vector<4xf32> to vector<4x1xf32>
    %cst_27 = arith.constant 3.906250e-03 : f32
    %65 = vector.broadcast %cst_27 : f32 to vector<4x1xf32>
    %66 = arith.mulf %61, %65 : vector<4x1xf32>
    %cst_28 = arith.constant 3.906250e-03 : f32
    %67 = vector.broadcast %cst_28 : f32 to vector<4x1xf32>
    %68 = arith.mulf %64, %67 : vector<4x1xf32>
    %69 = arith.mulf %66, %66 : vector<4x1xf32>
    %70 = arith.subf %68, %69 : vector<4x1xf32>
    %cst_29 = arith.constant 0.000000e+00 : f32
    %71 = vector.broadcast %cst_29 : f32 to vector<4x1xf32>
    %72 = arith.maximumf %70, %71 : vector<4x1xf32>
    %73 = vector.broadcast %66 : vector<4x1xf32> to vector<4x256xf32>
    %74 = arith.subf %59, %73 : vector<4x256xf32>
    %cst_30 = arith.constant 9.99999974E-6 : f32
    %75 = vector.broadcast %cst_30 : f32 to vector<4x1xf32>
    %76 = arith.addf %72, %75 : vector<4x1xf32>
    %77 = math.rsqrt %76 : vector<4x1xf32>
    %78 = vector.broadcast %77 : vector<4x1xf32> to vector<4x256xf32>
    %79 = arith.mulf %74, %78 : vector<4x256xf32>
    %cst_31 = arith.constant 0.000000e+00 : f32
    %80 = vector.broadcast %cst_31 : f32 to vector<4x256xf32>
    %81 = arith.maximumf %79, %80 : vector<4x256xf32>
    %c16_i32_32 = arith.constant 16 : i32
    %82 = tpu.dynamic_rotate %81 by %c16_i32_32 dim 1 : vector<4x256xf32>, i32 -> vector<4x256xf32>
    %c240_i32_33 = arith.constant 240 : i32
    %83 = tpu.dynamic_rotate %81 by %c240_i32_33 dim 1 : vector<4x256xf32>, i32 -> vector<4x256xf32>
    %84 = vector.shape_cast %4 : vector<1x256xi1> to vector<1x256xi1>
    %85 = vector.broadcast %84 : vector<1x256xi1> to vector<4x256xi1>
    %86 = arith.select %85, %83, %82 : vector<4x256xi1>, vector<4x256xf32>
    %87 = vector.shape_cast %6 : vector<1x256xi1> to vector<1x256xi1>
    %88 = vector.broadcast %87 : vector<1x256xi1> to vector<4x256xi1>
    %89 = arith.select %88, %82, %83 : vector<4x256xi1>, vector<4x256xf32>
    %c1_i32_34 = arith.constant 1 : i32
    %90 = tpu.dynamic_rotate %86 by %c1_i32_34 dim 1 : vector<4x256xf32>, i32 -> vector<4x256xf32>
    %c255_i32_35 = arith.constant 255 : i32
    %91 = tpu.dynamic_rotate %86 by %c255_i32_35 dim 1 : vector<4x256xf32>, i32 -> vector<4x256xf32>
    %92 = vector.shape_cast %8 : vector<1x256xi1> to vector<1x256xi1>
    %93 = vector.broadcast %92 : vector<1x256xi1> to vector<4x256xi1>
    %94 = arith.select %93, %91, %90 : vector<4x256xi1>, vector<4x256xf32>
    %95 = vector.shape_cast %10 : vector<1x256xi1> to vector<1x256xi1>
    %96 = vector.broadcast %95 : vector<1x256xi1> to vector<4x256xi1>
    %97 = arith.select %96, %90, %91 : vector<4x256xi1>, vector<4x256xf32>
    %c0_36 = arith.constant 0 : index
    %c0_37 = arith.constant 0 : index
    %98 = vector.load %arg7[%c0_36, %c0_37] : memref<36x256xf32, #tpu.memory_space<vmem>>, vector<4x256xf32>
    tpu.vector_store %arg7[%c0_36, %c0_37], %94 {strides = array<i32>} : memref<36x256xf32, #tpu.memory_space<vmem>>, vector<4x256xf32>,
    %c12_38 = arith.constant 12 : index
    %c0_39 = arith.constant 0 : index
    %99 = vector.load %arg7[%c12_38, %c0_39] : memref<36x256xf32, #tpu.memory_space<vmem>>, vector<4x256xf32>
    tpu.vector_store %arg7[%c12_38, %c0_39], %86 {strides = array<i32>} : memref<36x256xf32, #tpu.memory_space<vmem>>, vector<4x256xf32>,
    %c24_40 = arith.constant 24 : index
    %c0_41 = arith.constant 0 : index
    %100 = vector.load %arg7[%c24_40, %c0_41] : memref<36x256xf32, #tpu.memory_space<vmem>>, vector<4x256xf32>
    tpu.vector_store %arg7[%c24_40, %c0_41], %97 {strides = array<i32>} : memref<36x256xf32, #tpu.memory_space<vmem>>, vector<4x256xf32>,
    %c1_i32_42 = arith.constant 1 : i32
    %101 = tpu.dynamic_rotate %81 by %c1_i32_42 dim 1 : vector<4x256xf32>, i32 -> vector<4x256xf32>
    %c255_i32_43 = arith.constant 255 : i32
    %102 = tpu.dynamic_rotate %81 by %c255_i32_43 dim 1 : vector<4x256xf32>, i32 -> vector<4x256xf32>
    %103 = vector.shape_cast %8 : vector<1x256xi1> to vector<1x256xi1>
    %104 = vector.broadcast %103 : vector<1x256xi1> to vector<4x256xi1>
    %105 = arith.select %104, %102, %101 : vector<4x256xi1>, vector<4x256xf32>
    %106 = vector.shape_cast %10 : vector<1x256xi1> to vector<1x256xi1>
    %107 = vector.broadcast %106 : vector<1x256xi1> to vector<4x256xi1>
    %108 = arith.select %107, %101, %102 : vector<4x256xi1>, vector<4x256xf32>
    %c4_44 = arith.constant 4 : index
    %c0_45 = arith.constant 0 : index
    %109 = vector.load %arg7[%c4_44, %c0_45] : memref<36x256xf32, #tpu.memory_space<vmem>>, vector<4x256xf32>
    tpu.vector_store %arg7[%c4_44, %c0_45], %105 {strides = array<i32>} : memref<36x256xf32, #tpu.memory_space<vmem>>, vector<4x256xf32>,
    %c16_46 = arith.constant 16 : index
    %c0_47 = arith.constant 0 : index
    %110 = vector.load %arg7[%c16_46, %c0_47] : memref<36x256xf32, #tpu.memory_space<vmem>>, vector<4x256xf32>
    tpu.vector_store %arg7[%c16_46, %c0_47], %81 {strides = array<i32>} : memref<36x256xf32, #tpu.memory_space<vmem>>, vector<4x256xf32>,
    %c28_48 = arith.constant 28 : index
    %c0_49 = arith.constant 0 : index
    %111 = vector.load %arg7[%c28_48, %c0_49] : memref<36x256xf32, #tpu.memory_space<vmem>>, vector<4x256xf32>
    tpu.vector_store %arg7[%c28_48, %c0_49], %108 {strides = array<i32>} : memref<36x256xf32, #tpu.memory_space<vmem>>, vector<4x256xf32>,
    %c1_i32_50 = arith.constant 1 : i32
    %112 = tpu.dynamic_rotate %89 by %c1_i32_50 dim 1 : vector<4x256xf32>, i32 -> vector<4x256xf32>
    %c255_i32_51 = arith.constant 255 : i32
    %113 = tpu.dynamic_rotate %89 by %c255_i32_51 dim 1 : vector<4x256xf32>, i32 -> vector<4x256xf32>
    %114 = vector.shape_cast %8 : vector<1x256xi1> to vector<1x256xi1>
    %115 = vector.broadcast %114 : vector<1x256xi1> to vector<4x256xi1>
    %116 = arith.select %115, %113, %112 : vector<4x256xi1>, vector<4x256xf32>
    %117 = vector.shape_cast %10 : vector<1x256xi1> to vector<1x256xi1>
    %118 = vector.broadcast %117 : vector<1x256xi1> to vector<4x256xi1>
    %119 = arith.select %118, %112, %113 : vector<4x256xi1>, vector<4x256xf32>
    %c8_52 = arith.constant 8 : index
    %c0_53 = arith.constant 0 : index
    %120 = vector.load %arg7[%c8_52, %c0_53] : memref<36x256xf32, #tpu.memory_space<vmem>>, vector<4x256xf32>
    tpu.vector_store %arg7[%c8_52, %c0_53], %116 {strides = array<i32>} : memref<36x256xf32, #tpu.memory_space<vmem>>, vector<4x256xf32>,
    %c20_54 = arith.constant 20 : index
    %c0_55 = arith.constant 0 : index
    %121 = vector.load %arg7[%c20_54, %c0_55] : memref<36x256xf32, #tpu.memory_space<vmem>>, vector<4x256xf32>
    tpu.vector_store %arg7[%c20_54, %c0_55], %89 {strides = array<i32>} : memref<36x256xf32, #tpu.memory_space<vmem>>, vector<4x256xf32>,
    %c32_56 = arith.constant 32 : index
    %c0_57 = arith.constant 0 : index
    %122 = vector.load %arg7[%c32_56, %c0_57] : memref<36x256xf32, #tpu.memory_space<vmem>>, vector<4x256xf32>
    tpu.vector_store %arg7[%c32_56, %c0_57], %119 {strides = array<i32>} : memref<36x256xf32, #tpu.memory_space<vmem>>, vector<4x256xf32>,
    %c0_58 = arith.constant 0 : index
    %c0_59 = arith.constant 0 : index
    %123 = vector.load %arg4[%c0_58, %c0_59] : memref<4x36xf32, #tpu.memory_space<vmem>>, vector<4x36xf32>
    %c0_60 = arith.constant 0 : index
    %c0_61 = arith.constant 0 : index
    %124 = vector.load %arg7[%c0_60, %c0_61] : memref<36x256xf32, #tpu.memory_space<vmem>>, vector<36x256xf32>
    %cst_62 = arith.constant dense<0.000000e+00> : vector<4x256xf32>
    %125 = tpu.matmul %123, %124, %cst_62 {dimension_numbers = #tpu.dot_dimension_numbers<[1], [0], [0], [1], [0, 0, 1, 1], [], []>} : vector<4x36xf32>, vector<36x256xf32>, vector<4x256xf32> -> vector<4x256xf32>
    %c0_63 = arith.constant 0 : index
    %c0_64 = arith.constant 0 : index
    %126 = vector.load %arg5[%c0_63, %c0_64] : memref<4x1xf32, #tpu.memory_space<vmem>>, vector<4x1xf32>
    %127 = vector.broadcast %126 : vector<4x1xf32> to vector<4x256xf32>
    %128 = arith.addf %125, %127 : vector<4x256xf32>
    %cst_65 = arith.constant dense<0.000000e+00> : vector<4xf32>
    %129 = vector.multi_reduction <add>, %128, %cst_65 [1] : vector<4x256xf32> to vector<4xf32>
    %130 = vector.shape_cast %129 : vector<4xf32> to vector<4x1xf32>
    %131 = arith.mulf %128, %128 : vector<4x256xf32>
    %cst_66 = arith.constant dense<0.000000e+00> : vector<4xf32>
    %132 = vector.multi_reduction <add>, %131, %cst_66 [1] : vector<4x256xf32> to vector<4xf32>
    %133 = vector.shape_cast %132 : vector<4xf32> to vector<4x1xf32>
    %cst_67 = arith.constant 3.906250e-03 : f32
    %134 = vector.broadcast %cst_67 : f32 to vector<4x1xf32>
    %135 = arith.mulf %130, %134 : vector<4x1xf32>
    %cst_68 = arith.constant 3.906250e-03 : f32
    %136 = vector.broadcast %cst_68 : f32 to vector<4x1xf32>
    %137 = arith.mulf %133, %136 : vector<4x1xf32>
    %138 = arith.mulf %135, %135 : vector<4x1xf32>
    %139 = arith.subf %137, %138 : vector<4x1xf32>
    %cst_69 = arith.constant 0.000000e+00 : f32
    %140 = vector.broadcast %cst_69 : f32 to vector<4x1xf32>
    %141 = arith.maximumf %139, %140 : vector<4x1xf32>
    %142 = vector.broadcast %135 : vector<4x1xf32> to vector<4x256xf32>
    %143 = arith.subf %128, %142 : vector<4x256xf32>
    %cst_70 = arith.constant 9.99999974E-6 : f32
    %144 = vector.broadcast %cst_70 : f32 to vector<4x1xf32>
    %145 = arith.addf %141, %144 : vector<4x1xf32>
    %146 = math.rsqrt %145 : vector<4x1xf32>
    %147 = vector.broadcast %146 : vector<4x1xf32> to vector<4x256xf32>
    %148 = arith.mulf %143, %147 : vector<4x256xf32>
    %c0_71 = arith.constant 0 : index
    %c0_72 = arith.constant 0 : index
    %c0_73 = arith.constant 0 : index
    %149 = vector.load %arg1[%c0_71, %c0_72, %c0_73] : memref<1x4x256xf32, #tpu.memory_space<vmem>>, vector<1x4x256xf32>
    %150 = vector.shape_cast %149 : vector<1x4x256xf32> to vector<4x256xf32>
    %151 = arith.addf %150, %148 : vector<4x256xf32>
    %c0_74 = arith.constant 0 : index
    %c0_75 = arith.constant 0 : index
    %c0_76 = arith.constant 0 : index
    %152 = vector.load %arg6[%c0_74, %c0_75, %c0_76] : memref<1x4x256xf32, #tpu.memory_space<vmem>>, vector<1x4x256xf32>
    %153 = vector.shape_cast %152 : vector<1x4x256xf32> to vector<4x256xf32>
    %154 = vector.shape_cast %151 : vector<4x256xf32> to vector<1x4x256xf32>
    tpu.vector_store %arg6[%c0_74, %c0_75, %c0_76], %154 {strides = array<i32>} : memref<1x4x256xf32, #tpu.memory_space<vmem>>, vector<1x4x256xf32>,
    return
  }
  func.func @transform_0(%arg0: i32) -> (i32, i32, i32) {
    %c0_i32 = arith.constant 0 : i32
    %c0_i32_0 = arith.constant 0 : i32
    %c0_i32_1 = arith.constant 0 : i32
    return %arg0, %c0_i32, %c0_i32_0 : i32, i32, i32
  }
  func.func @transform_1(%arg0: i32) -> (i32, i32) {
    %c0_i32 = arith.constant 0 : i32
    %c0_i32_0 = arith.constant 0 : i32
    %c0_i32_1 = arith.constant 0 : i32
    return %c0_i32, %c0_i32_0 : i32, i32
  }
  func.func @transform_2(%arg0: i32) -> (i32, i32) {
    %c0_i32 = arith.constant 0 : i32
    %c0_i32_0 = arith.constant 0 : i32
    %c0_i32_1 = arith.constant 0 : i32
    return %c0_i32, %c0_i32_0 : i32, i32
  }
  func.func @transform_3(%arg0: i32) -> (i32, i32) {
    %c0_i32 = arith.constant 0 : i32
    %c0_i32_0 = arith.constant 0 : i32
    %c0_i32_1 = arith.constant 0 : i32
    return %c0_i32, %c0_i32_0 : i32, i32
  }
  func.func @transform_4(%arg0: i32) -> (i32, i32) {
    %c0_i32 = arith.constant 0 : i32
    %c0_i32_0 = arith.constant 0 : i32
    %c0_i32_1 = arith.constant 0 : i32
    return %c0_i32, %c0_i32_0 : i32, i32
  }
  func.func @transform_5(%arg0: i32) -> (i32, i32, i32) {
    %c0_i32 = arith.constant 0 : i32
    %c0_i32_0 = arith.constant 0 : i32
    %c0_i32_1 = arith.constant 0 : i32
    return %arg0, %c0_i32, %c0_i32_0 : i32, i32, i32
  }
}

</mosaic_0001>

<bundles_post_ra>
// kernel: tpu_custom_call.1
= control target key start
LH: loop header
LB: loop body
LE: loop exit
PB: predicated region body
PF: predicated region fallthrough
CT: control target
= control target key end

     0   :  { %10 = vsyncpa [#allocation4], 0  ;;  %s1438_s0 = inlined_call_operand.hbm [shape: f32[2,4,256], index: 0, kind: input, shape index: {}]   ;;  %s1439_s1 = inlined_call_operand.vmem [shape: f32[4,36], index: 1, kind: input, shape index: {}]   ;;  %s1440_s2 = inlined_call_operand.vmem [shape: f32[4,1], index: 2, kind: input, shape index: {}]   ;;  %s1441_s3 = inlined_call_operand.vmem [shape: f32[4,36], index: 3, kind: input, shape index: {}]   ;;  %s1442_s4 = inlined_call_operand.vmem [shape: f32[4,1], index: 4, kind: input, shape index: {}]   ;;  %s1443_s5 = inlined_call_operand.hbm [shape: f32[2,4,256], index: 5, kind: output, shape index: {}]  }
   0x1   :  { %12 = vsyncpa [#allocation4 + $0x1], 0 }
   0x2   :  { %13 = vsyncpa [#allocation5], 0 }
   0x3   :  { %15 = vsyncpa [#allocation5 + $0x1], 0  ;;  %s1057_s18 = smov 0   ;;  %s1059_s19 = smov 0  }
   0x4   :  { %s1061_s20 = smov 0   ;;  %s1063_s21 = smov 0  }
   0x5 LB: > { %s1078_s22 = sadd.s32 4294967295, %s1017_s21   ;;  %s825_s23 = sadd.s32 4294967294, %s1017_s21   ;;  %s1017_s21 = sphi %s1063_s21, %s1466_s21   ;;  %s1013_s20 = sphi %s1061_s20, %s1465_s20   ;;  %s1009_s19 = sphi %s1059_s19, %s1464_s19   ;;  %s1005_s18 = sphi %s1057_s18, %s1463_s18  }
   0x6   : > { %s1082_s24 = sadd.s32 1, %s1017_s21   ;;  %s28_s25 = sadd.s32 1, %s1013_s20 }
   0x7   : > { %s25_s26 = ssub.s32 %s1017_s21, %s1082_s24  ;;  %p35_p0 = scmp.ne.s32.totalorder %s1013_s20, %s1009_s19 }
   0x8   : > { %p26_p1 = scmp.eq.s32.totalorder %s25_s26, 0  ;;  %p36_p2 = scmp.eq.s32.totalorder %s1017_s21, 0 }
   0x9   : > { %p41_p3 = scmp.ne.s32.totalorder %s1009_s19, %s1005_s18  ;;  %p42_p4 = scmp.eq.s32.totalorder %s1078_s22, 0 }
   0xa   : > { %s1094_s27 = scalar_select %p26_p1, %s1013_s20, %s28_s25  }
   0xb   : > { %p1096_p5 = por %p36_p2, %p35_p0  ;;  %p1100_p6 = por %p42_p4, %p41_p3 }
   0xc   : > { %p149_p7 = scmp.eq.s32.totalorder %s1078_s22, 1  ;;  %p155_p8 = scmp.eq.s32.totalorder %s825_s23, 1 }
   0xd   : > { %p875_p10 = scmp.lt.s32.totalorder %s1017_s21, 2  ;;  %s187_s7 = sand.u32 1, %s1013_s20  }
   0xe   : > { %p1107_p11 = por %p149_p7, %p35_p0  ;;  %p1111_p12 = por %p155_p8, %p41_p3 }
   0xf   : > { %s845_s8 = sshll.u32 %s1017_s21, 7  ;;  %s828_s9 = sshll.u32 %s187_s7, 3 }
  0x10   : > { %s1447_s30 = scalar_select %p1107_p11, 1, 0 }
  0x11   : > { %s1448_s6 = scalar_select %p1111_p12, 1, 0 }
  0x12   : > { %s1120_s12 = scalar_lea.hbm %s1438_s0, %s845_s8  ;;  %s191_s13 = scalar_lea.vmem [#allocation3], %s828_s9 }
  0x13   : > { %s199_s14 = sshll.u32 %s191_s13, 4  ;;  %p1124_p13 = pnand %p875_p10, %p1096_p5  ;;  %s1128_s14 = int_to_ptr.vmem [resolvable:$true] %s199_s14 }
  0x14   : > { %s188_s16 = scalar_lea.sflag [#allocation4], %s187_s7  ;;  %s921_s17 = scalar_lea.hbm %s1120_s12, 128 }
  0x15   : > { %p922_p2 = scmp.ne.s32.totalorder %s1120_s12, %s921_s17  ;;  %p923_p3 = pneg %p1124_p13 }
  0x16   : > { %s926_s26 = scalar_lea.hbm %s1438_s0, 256  ;;  %p927_p5 = scmp.lt.u32.totalorder %s1120_s12, %s1438_s0 }
  0x17   : > { %p924_p4 = pnand %p923_p3, %p922_p2  ;;  %p928_p8 = scmp.lt.u32.totalorder %s926_s26, %s921_s17 }
  0x18   : > { %p930_p9 = scmp.lt.u32.totalorder %s921_s17, %s1120_s12 }
  0x19   : > { %p925_p7 = pneg %p924_p4  ;;  %p929_p10 = por %p928_p8, %p927_p5 }
  0x1b   : > { %p931_p0 = por %p930_p9, %p929_p10 }
  0x1d   : > { %p932_p1 = pnand %p931_p0, %p925_p7 }
  0x1f   : > { %935 = shalt.err (!%p932_p1)
}
  0x20   : > { %s936_s7 = scalar_lea.vmem %s1128_s14, 128  ;;  %s1019_s9 = smov [#allocation3]  }
  0x21   : > { %p937_p2 = scmp.ne.s32.totalorder %s1128_s14, %s936_s7  ;;  %s941_s10 = sshll.u32 %s1019_s9, 4  ;;  %s942_s10 = int_to_ptr.vmem [resolvable:$false] %s941_s10 }
  0x22   : > { %s943_s11 = scalar_lea.vmem %s942_s10, 256  ;;  %p944_p11 = scmp.lt.s32.totalorder %s1128_s14, %s942_s10 }
  0x23   : > { %p939_p4 = pnand %p937_p2, %p923_p3  ;;  %p945_p5 = scmp.lt.s32.totalorder %s943_s11, %s936_s7 }
  0x25   : > { %p940_p12 = pneg %p939_p4  ;;  %p946_p8 = por %p945_p5, %p944_p11 }
  0x27   : > { %p947_p9 = pnand %p946_p8, %p940_p12 }
  0x29   : > { %950 = shalt.err (!%p947_p9)
}
  0x2a   : > { %870 = dma.hbm_to_vmem [thread:$0]  (!%p1124_p13), %s1120_s12, 128, %s1128_s14, %s188_s16  }
  0x2b   : > { %p1450_p0 = scmp.lt.s32.totalorder %s1017_s21, 3  ;;  %p1451_p1 = scmp.ge.s32.totalorder %s1017_s21, 1 }
  0x2d   : > { %p205_p3 = pnand %p1451_p1, %p1450_p0 }
  0x2e   : > { %s1162_s13 = sand.u32 (!%p205_p3), 1, %s1009_s19  }
  0x2f   : > { %208 = sbr.rel (%p205_p3) target bundleno = 1384 (0x568), region = 40  ;;  %s832_s17 = sshll.u32 (!%p205_p3), %s1162_s13, 3 }
  0x30   : > { %s211_s23 = scalar_lea.sflag (!%p205_p3), [#allocation4], %s1162_s13  ;;  %s214_s15 = scalar_lea.vmem (!%p205_p3), [#allocation3], %s832_s17 }
  0x36   : > { %996 = dma.done.wait (%p1100_p6), %s211_s23, 128  }
  0x37   : > { %998 = vsyncadd (%p1100_p6), %s211_s23, 4294967168  ;;  %v1172_v0 = vld [vmem:[%s214_s15] sm:$0xff]  ;;  %s1020_s12 = smov 112   ;;  %s1021_s14 = smov 16   ;;  %v241_v2 = vlaneseq  ;;  %v1024_v41 = vmov 0.0   ;;  %v1025_v43 = vmov 0  }
  0x38   : > { %264 = vrot.lane.b32.xlu1 %v1172_v0, %s1020_s12  ;;  %345 = vst [vmem:[#allocation2 + $0x20] sm:$0xf] %v1172_v0  ;;  %258 = vrot.lane.b32.xlu0 %v1172_v0, %s1021_s14  ;;  %v256_v1 = vcombine.high %v1172_v0, %v1172_v0  ;;  %s1022_s29 = smov 1   ;;  %s1023_s16 = smov 127   ;;  %v394_v42 = vld [vmem:[%s1440_s2] sm:$0xf] }
  0x39   : > { %v1189_v3 = vand.u32 127, %v241_v2  ;;  %475 = vmatprep.mubr.f32.mxu0 %v1024_v41  ;;  %703 = vmatprep.mubr.f32.mxu1 %v1024_v41  ;;  %vm404_vm9 = vcmask 1043456   ;;  %vm400_vm10 = vcmask 293888   ;;  %s846_s23 = sshll.u32 %s1078_s22, 7  ;;  %s240_s15 = scalar_lea.vmem [#allocation6], %s832_s17 }
  0x3a   : > { %346 = vst [vmem:[#allocation2 + $0x28] sm:$0xf] %v256_v1  ;;  %915 = vset.pattern.permute.xlu0 %v1025_v43  ;;  %s741_s25 = scalar_lea.sflag [#allocation5], %s1162_s13  ;;  %p1460_p11 = scmp.ne.s32.totalorder %s1447_s30, 0 }
  0x3b   : > { %v1192_v4 = vadd.s32 128, %v1189_v3  ;;  %vm268_vm0 = vcmp.lt.s32.totalorder %v1189_v3, 112  ;;  %vm246_vm1 = vcmp.lt.s32.totalorder %v1189_v3, 16  ;;  %v244_v20 = vand.u32 15, %v1189_v3  ;;  %s1026_s22 = smov [#allocation6]  }
  0x3c   : > { %266 = vrot.lane.b32.xlu1 %v256_v1, %s1020_s12  ;;  %260 = vrot.lane.b32.xlu0 %v256_v1, %s1021_s14  ;;  %vm287_vm3 = vcmp.lt.s32.totalorder %v1189_v3, 1  ;;  %vm294_vm5 = vcmp.lt.s32.totalorder %v1189_v3, 127  ;;  %s955_s17 = sshll.u32 %s1026_s22, 4  ;;  %s956_s17 = int_to_ptr.vmem [resolvable:$false] %s955_s17 }
  0x3d   : > { %vm249_vm2 = vcmp.ge.s32.totalorder %v1192_v4, 240  ;;  %v245_v9 = vand.u32 15, %v1192_v4  ;;  %vm1225_vm6 = vcmp.eq.s32.totalorder %v244_v20, 0  ;;  %vm1229_vm7 = vcmp.eq.s32.totalorder %v244_v20, 15  ;;  %v383_v20 = vld [vmem:[%s1439_s1] sm:$0xf] }
  0x3e   : > { %s957_s28 = scalar_lea.vmem %s956_s17, 256 }
  0x3f   : > { %vm1216_vm4 = vcmp.eq.s32.totalorder %v245_v9, 0  ;;  %vm1233_vm8 = vcmp.eq.s32.totalorder %v245_v9, 15 }
  0x40   : > { %323 = vrot.lane.b32.xlu1 %v256_v1, %s1022_s29  ;;  %321 = vrot.lane.b32.xlu0 %v1172_v0, %s1022_s29 }
  0x44   : > { %329 = vrot.lane.b32.xlu1 %v256_v1, %s1023_s16  ;;  %327 = vrot.lane.b32.xlu0 %v1172_v0, %s1023_s16 }
  0xaa   : > { %v265_v5 = vpop.permute.xlu1 %264  ;;  %v259_v6 = vpop.permute.xlu0 %258 }
  0xae   : > { %v267_v7 = vpop.permute.xlu1 %266  ;;  %v261_v8 = vpop.permute.xlu0 %260 }
  0xaf   : > { %v269_v10 = vsel %vm268_vm0, %v265_v5, %v267_v7  ;;  %v270_v11 = vsel %vm268_vm0, %v267_v7, %v265_v5  ;;  %v262_v12 = vsel %vm246_vm1, %v259_v6, %v261_v8  ;;  %v263_v13 = vsel %vm246_vm1, %v261_v8, %v259_v6 }
  0xb0   : > { %v375_v14 = vrot.slane %v269_v10, 4  ;;  %v314_v15 = vrot.slane %v262_v12, 4  ;;  %355 = vrot.lane.b32.xlu0 %v269_v10, %s1022_s29  ;;  %285 = vrot.lane.b32.xlu1 %v262_v12, %s1022_s29  ;;  %v275_v16 = vsel %vm246_vm1, %v269_v10, %v263_v13  ;;  %v282_v17 = vsel %vm249_vm2, %v262_v12, %v270_v11 }
  0xb1   : > { %v313_v18 = vrot.slane %v275_v16, 4  ;;  %v376_v19 = vrot.slane %v282_v17, 4 }
  0xb2   : > { %379 = vst [vmem:[#allocation2 + $0x20] sm:$0xf0] %v375_v14  ;;  %318 = vst [vmem:[#allocation2 + $0x18] sm:$0xf0] %v314_v15  ;;  %v324_v21 = vpop.permute.xlu1 %323  ;;  %v322_v22 = vpop.permute.xlu0 %321 }
  0xb3   : > { %317 = vst [vmem:[#allocation2 + $0x10] sm:$0xf0] %v313_v18  ;;  %380 = vst [vmem:[#allocation2 + $0x28] sm:$0xf0] %v376_v19  ;;  %v325_v24 = vsel %vm287_vm3, %v322_v22, %v324_v21  ;;  %v326_v25 = vsel %vm287_vm3, %v324_v21, %v322_v22 }
  0xb4   : > { %283 = vrot.lane.b32.xlu0 %v275_v16, %s1022_s29  ;;  %292 = vrot.lane.b32.xlu1 %v262_v12, %s1023_s16 }
  0xb6   : > { %v330_v29 = vpop.permute.xlu1 %329  ;;  %v328_v30 = vpop.permute.xlu0 %327 }
  0xb7   : > { %v331_v31 = vsel %vm294_vm5, %v328_v30, %v330_v29  ;;  %v332_v32 = vsel %vm294_vm5, %v330_v29, %v328_v30 }
  0xb8   : > { %290 = vrot.lane.b32.xlu0 %v275_v16, %s1023_s16  ;;  %357 = vrot.lane.b32.xlu1 %v282_v17, %s1022_s29  ;;  %v333_v33 = vsel %vm1225_vm6, %v331_v31, %v326_v25  ;;  %v334_v34 = vsel %vm1216_vm4, %v332_v32, %v325_v24  ;;  %v335_v35 = vsel %vm1229_vm7, %v326_v25, %v331_v31 }
  0xb9   : > { %v336_v36 = vsel %vm1233_vm8, %v325_v24, %v332_v32  ;;  %v339_v37 = vrot.slane %v333_v33, 4  ;;  %v340_v38 = vrot.slane %v334_v34, 4  ;;  %v349_v39 = vrot.slane %v335_v35, 4 }
  0xba   : > { %v350_v40 = vrot.slane %v336_v36, 4  ;;  %v389_v14 = vld [vmem:[#allocation2 + $0x28] sm:$0xff] }
  0xbb   : > { %343 = vst [vmem:[#allocation2] sm:$0xf0] %v339_v37  ;;  %344 = vst [vmem:[#allocation2 + $0x8] sm:$0xf0] %v340_v38 }
  0xbc   : > { %353 = vst [vmem:[#allocation2 + $0x30] sm:$0xf0] %v349_v39  ;;  %361 = vrot.lane.b32.xlu0 %v269_v10, %s1023_s16  ;;  %363 = vrot.lane.b32.xlu1 %v282_v17, %s1023_s16  ;;  %354 = vst [vmem:[#allocation2 + $0x38] sm:$0xf0] %v350_v40  ;;  %v388_v17 = vld [vmem:[#allocation2 + $0x20] sm:$0xff] }
  0xc0   : > { %397 = vperm.xlu0 %915, %v394_v42  }
 0x122   : > { %v286_v44 = vpop.permute.xlu1 %285  ;;  %v356_v45 = vpop.permute.xlu0 %355 }
 0x126   : > { %v293_v46 = vpop.permute.xlu1 %292  ;;  %v284_v47 = vpop.permute.xlu0 %283 }
 0x127   : > { %v288_v50 = vsel %vm287_vm3, %v284_v47, %v286_v44  ;;  %v289_v51 = vsel %vm287_vm3, %v286_v44, %v284_v47 }
 0x12a   : > { %v358_v48 = vpop.permute.xlu1 %357  ;;  %v291_v49 = vpop.permute.xlu0 %290 }
 0x12b   : > { %v295_v52 = vsel %vm294_vm5, %v291_v49, %v293_v46  ;;  %v296_v53 = vsel %vm294_vm5, %v293_v46, %v291_v49  ;;  %v359_v60 = vsel %vm287_vm3, %v356_v45, %v358_v48  ;;  %v360_v61 = vsel %vm287_vm3, %v358_v48, %v356_v45 }
 0x12c   : > { %v301_v54 = vsel %vm1225_vm6, %v295_v52, %v289_v51  ;;  %v302_v55 = vsel %vm1216_vm4, %v296_v53, %v288_v50  ;;  %v307_v56 = vsel %vm1229_vm7, %v289_v51, %v295_v52  ;;  %v308_v57 = vsel %vm1233_vm8, %v288_v50, %v296_v53 }
 0x12d   : > { %309 = vst [vmem:[#allocation2] sm:$0xf] %v301_v54  ;;  %310 = vst [vmem:[#allocation2 + $0x8] sm:$0xf] %v302_v55 }
 0x12e   : > { %319 = vst [vmem:[#allocation2 + $0x30] sm:$0xf] %v307_v56  ;;  %320 = vst [vmem:[#allocation2 + $0x38] sm:$0xf] %v308_v57  ;;  %v364_v58 = vpop.permute.xlu1 %363  ;;  %v362_v59 = vpop.permute.xlu0 %361 }
 0x12f   : > { %v365_v62 = vsel %vm294_vm5, %v362_v59, %v364_v58  ;;  %v366_v63 = vsel %vm294_vm5, %v364_v58, %v362_v59 }
 0x130   : > { %v367_v1 = vsel %vm1225_vm6, %v365_v62, %v360_v61  ;;  %v368_v2 = vsel %vm1216_vm4, %v366_v63, %v359_v60  ;;  %v369_v5 = vsel %vm1229_vm7, %v360_v61, %v365_v62  ;;  %v370_v6 = vsel %vm1233_vm8, %v359_v60, %v366_v63 }
 0x131   : > { %371 = vst [vmem:[#allocation2 + $0x10] sm:$0xf] %v367_v1  ;;  %372 = vst [vmem:[#allocation2 + $0x18] sm:$0xf] %v368_v2 }
 0x132   : > { %381 = vst [vmem:[#allocation2 + $0x40] sm:$0xf] %v369_v5  ;;  %382 = vst [vmem:[#allocation2 + $0x48] sm:$0xf] %v370_v6 }
 0x134   : > { %v385_v7 = vld [vmem:[#allocation2 + $0x8] sm:$0xff]  ;;  %v384_v8 = vld [vmem:[#allocation2] sm:$0xff] }
 0x135   : > { %v391_v11 = vld [vmem:[#allocation2 + $0x38] sm:$0xff]  ;;  %v390_v16 = vld [vmem:[#allocation2 + $0x30] sm:$0xff] }
 0x136   : > { %v851_v15 = vpack.c.bf16 %v391_v11, %v389_v14  ;;  %v853_v18 = vpack.c.bf16 %v390_v16, %v388_v17 }
 0x138   : > { %v387_v9 = vld [vmem:[#allocation2 + $0x18] sm:$0xff]  ;;  %v386_v10 = vld [vmem:[#allocation2 + $0x10] sm:$0xff] }
 0x139   : > { %v847_v12 = vpack.c.bf16 %v387_v9, %v385_v7  ;;  %v849_v13 = vpack.c.bf16 %v386_v10, %v384_v8  ;;  %v393_v19 = vld [vmem:[#allocation2 + $0x48] sm:$0xf]  ;;  %v392_v21 = vld [vmem:[#allocation2 + $0x40] sm:$0xf] }
 0x13b   : > { %848 = vmatprep.subr.bf16.mxu0 %v847_v12 }
 0x13c   : > { %850 = vmatpush1.bf16.msra.mxu0 %v849_v13 }
 0x13d   : > { %852 = vmatprep.subr.bf16.mxu0 %v851_v15 }
 0x13f   : > { %v398_v22 = vpop.permute.xlu0 %397 }
 0x140   : > { %854 = vmatpush1.bf16.msra.mxu0 %v853_v18 }
 0x141   : > { %834 = vmatprep.subr.msk.mxu0 %vm404_vm9, %v393_v19 }
 0x144   : > { %835 = vmatpush1.msk.msra.mxu0 %vm404_vm9, %v392_v21 }
 0x145   : > { %836 = vmatmul.mubr.msk.f32.vlgmr.msra.gmra.mrb[0].mxu0 %vm400_vm10, %v383_v20 }
 0x218   : > { %v477_v24 = vpop.f32.mrb[0].mxu0 }
 0x219   : > { %v478_v25 = vadd.f32 %v477_v24, %v398_v22  ;;  %v479_v29 = vpop.f32.mrb[1].mxu0 }
 0x21a   : > { %v480_v30 = vadd.f32 %v479_v29, %v398_v22  ;;  %v624_v22 = vld [vmem:[%s1442_s4] sm:$0xf] }
 0x21b   : > { %v482_v31 = vsel %vm404_vm9, %v478_v25, 0.0  ;;  %v487_v32 = vmul.f32 %v478_v25, %v478_v25 }
 0x21c   : > { %v483_v33 = vsel %vm404_vm9, %v480_v30, 0.0  ;;  %v488_v34 = vmul.f32 %v480_v30, %v480_v30 }
 0x21d   : > { %v484_v35 = vadd.f32 %v483_v33, %v482_v31  ;;  %v489_v36 = vsel %vm404_vm9, %v487_v32, 0.0 }
 0x21e   : > { %v490_v37 = vsel %vm404_vm9, %v488_v34, 0.0 }
 0x21f   : > { %485 = vadd.xlane.f32.xlu1 %v484_v35  ;;  %v491_v38 = vadd.f32 %v490_v37, %v489_v36 }
 0x221   : > { %492 = vadd.xlane.f32.xlu0 %v491_v38 }
 0x2ac   : > { %v486_v39 = vpop.xlane.xlu1 %485 }
 0x2ad   : > { %v494_v40 = vmul.f32 0.00390625, %v486_v39 }
 0x2ae   : > { %v493_v41 = vpop.xlane.xlu0 %492 }
 0x2af   : > { %v495_v42 = vmul.f32 0.00390625, %v493_v41  ;;  %v496_v43 = vmul.f32 %v494_v40, %v494_v40  ;;  %v499_v47 = vsub.f32 %v478_v25, %v494_v40  ;;  %v500_v48 = vsub.f32 %v480_v30, %v494_v40 }
 0x2b1   : > { %v497_v44 = vsub.f32 %v495_v42, %v496_v43 }
 0x2b3   : > { %v498_v45 = vmax.f32 %v497_v44, 0.0 }
 0x2b5   : > { %v501_v46 = vadd.f32 1e-05, %v498_v45 }
 0x2b7   : > { %917 = vrsqrt.f32 %v501_v46 }
 0x2c1   : > { %v918_v49 = vpop.eup %917 }
 0x2c2   : > { %v504_v50 = vmul.f32 %v918_v49, %v500_v48  ;;  %v503_v51 = vmul.f32 %v918_v49, %v499_v47 }
 0x2c4   : > { %v506_v52 = vmax.f32 %v504_v50, 0.0  ;;  %v505_v53 = vmax.f32 %v503_v51, 0.0 }
 0x2c6   : > { %509 = vrot.lane.b32.xlu0 %v506_v52, %s1021_s14  ;;  %576 = vst [vmem:[#allocation2 + $0x28] sm:$0xf] %v506_v52  ;;  %507 = vrot.lane.b32.xlu1 %v505_v53, %s1021_s14  ;;  %575 = vst [vmem:[#allocation2 + $0x20] sm:$0xf] %v505_v53 }
 0x2ca   : > { %551 = vrot.lane.b32.xlu0 %v505_v53, %s1022_s29  ;;  %513 = vrot.lane.b32.xlu1 %v505_v53, %s1020_s12 }
 0x2ce   : > { %557 = vrot.lane.b32.xlu0 %v505_v53, %s1023_s16  ;;  %515 = vrot.lane.b32.xlu1 %v506_v52, %s1020_s12  ;;  %s755_s12 = sshll.u32 %s240_s15, 4  ;;  %s1396_s12 = int_to_ptr.vmem [resolvable:$true] %s755_s12 }
 0x2cf   : > { %s951_s26 = scalar_lea.vmem %s1396_s12, 128  ;;  %p958_p7 = scmp.lt.s32.totalorder %s1396_s12, %s956_s17 }
 0x2d0   : > { %p952_p6 = scmp.ne.s32.totalorder %s1396_s12, %s951_s26  ;;  %p959_p10 = scmp.lt.s32.totalorder %s957_s28, %s951_s26 }
 0x2d2   : > { %553 = vrot.lane.b32.xlu1 %v506_v52, %s1022_s29  ;;  %p953_p12 = pnand %p952_p6, %p1460_p11  ;;  %p960_p2 = por %p959_p10, %p958_p7 }
 0x2d4   : > { %p954_p13 = pneg %p953_p12 }
 0x2d6   : > { %559 = vrot.lane.b32.xlu1 %v506_v52, %s1023_s16  ;;  %p961_p4 = pnand %p960_p2, %p954_p13 }
 0x338   : > { %v510_v54 = vpop.permute.xlu0 %509  ;;  %v508_v55 = vpop.permute.xlu1 %507 }
 0x339   : > { %v511_v56 = vsel %vm246_vm1, %v508_v55, %v510_v54  ;;  %v512_v60 = vsel %vm246_vm1, %v510_v54, %v508_v55 }
 0x33a   : > { %v544_v57 = vrot.slane %v511_v56, 4  ;;  %525 = vrot.lane.b32.xlu1 %v511_v56, %s1022_s29 }
 0x33c   : > { %548 = vst [vmem:[#allocation2 + $0x18] sm:$0xf0] %v544_v57  ;;  %v514_v58 = vpop.permute.xlu1 %513  ;;  %v552_v63 = vpop.permute.xlu0 %551 }
 0x33e   : > { %531 = vrot.lane.b32.xlu1 %v511_v56, %s1023_s16 }
 0x340   : > { %v516_v59 = vpop.permute.xlu1 %515  ;;  %v558_v9 = vpop.permute.xlu0 %557 }
 0x341   : > { %v517_v61 = vsel %vm268_vm0, %v514_v58, %v516_v59  ;;  %v518_v62 = vsel %vm268_vm0, %v516_v59, %v514_v58  ;;  %v613_v59 = vld [vmem:[%s1441_s3] sm:$0xf] }
 0x342   : > { %v605_v1 = vrot.slane %v517_v61, 4  ;;  %585 = vrot.lane.b32.xlu0 %v517_v61, %s1022_s29  ;;  %v522_v2 = vsel %vm249_vm2, %v511_v56, %v518_v62  ;;  %v519_v5 = vsel %vm246_vm1, %v517_v61, %v512_v60 }
 0x343   : > { %587 = vrot.lane.b32.xlu1 %v522_v2, %s1022_s29  ;;  %v606_v6 = vrot.slane %v522_v2, 4  ;;  %v543_v7 = vrot.slane %v519_v5, 4 }
 0x344   : > { %609 = vst [vmem:[#allocation2 + $0x20] sm:$0xf0] %v605_v1  ;;  %v554_v8 = vpop.permute.xlu1 %553 }
 0x345   : > { %610 = vst [vmem:[#allocation2 + $0x28] sm:$0xf0] %v606_v6  ;;  %547 = vst [vmem:[#allocation2 + $0x10] sm:$0xf0] %v543_v7  ;;  %v555_v4 = vsel %vm287_vm3, %v552_v63, %v554_v8  ;;  %v556_v11 = vsel %vm287_vm3, %v554_v8, %v552_v63 }
 0x346   : > { %523 = vrot.lane.b32.xlu0 %v519_v5, %s1022_s29 }
 0x347   : > { %593 = vrot.lane.b32.xlu1 %v522_v2, %s1023_s16 }
 0x348   : > { %v560_v10 = vpop.permute.xlu1 %559 }
 0x349   : > { %v561_v12 = vsel %vm294_vm5, %v558_v9, %v560_v10  ;;  %v562_v13 = vsel %vm294_vm5, %v560_v10, %v558_v9 }
 0x34a   : > { %v563_v14 = vsel %vm1225_vm6, %v561_v12, %v556_v11  ;;  %v564_v15 = vsel %vm1216_vm4, %v562_v13, %v555_v4  ;;  %v565_v16 = vsel %vm1229_vm7, %v556_v11, %v561_v12  ;;  %v566_v17 = vsel %vm1233_vm8, %v555_v4, %v562_v13  ;;  %529 = vrot.lane.b32.xlu0 %v519_v5, %s1023_s16 }
 0x34b   : > { %v569_v18 = vrot.slane %v563_v14, 4  ;;  %v570_v19 = vrot.slane %v564_v15, 4  ;;  %v579_v20 = vrot.slane %v565_v16, 4  ;;  %v580_v21 = vrot.slane %v566_v17, 4  ;;  %v618_v27 = vld [vmem:[#allocation2 + $0x20] sm:$0xff] }
 0x34c   : > { %v619_v56 = vld [vmem:[#allocation2 + $0x28] sm:$0xff] }
 0x34d   : > { %573 = vst [vmem:[#allocation2] sm:$0xf0] %v569_v18  ;;  %574 = vst [vmem:[#allocation2 + $0x8] sm:$0xf0] %v570_v19 }
 0x34e   : > { %583 = vst [vmem:[#allocation2 + $0x30] sm:$0xf0] %v579_v20  ;;  %584 = vst [vmem:[#allocation2 + $0x38] sm:$0xf0] %v580_v21  ;;  %591 = vrot.lane.b32.xlu0 %v517_v61, %s1023_s16  ;;  %s1394_s16 = scalar_lea.hbm %s1443_s5, %s846_s23 }
 0x352   : > { %627 = vperm.xlu0 %915, %v624_v22  }
 0x3ac   : > { %v526_v24 = vpop.permute.xlu1 %525 }
 0x3b0   : > { %v532_v25 = vpop.permute.xlu1 %531 }
 0x3b4   : > { %v586_v29 = vpop.permute.xlu0 %585 }
 0x3b5   : > { %v588_v31 = vpop.permute.xlu1 %587 }
 0x3b6   : > { %v589_v43 = vsel %vm287_vm3, %v586_v29, %v588_v31  ;;  %v590_v44 = vsel %vm287_vm3, %v588_v31, %v586_v29 }
 0x3b8   : > { %v524_v30 = vpop.permute.xlu0 %523 }
 0x3b9   : > { %v527_v33 = vsel %vm287_vm3, %v524_v30, %v526_v24  ;;  %v528_v34 = vsel %vm287_vm3, %v526_v24, %v524_v30  ;;  %v594_v41 = vpop.permute.xlu1 %593 }
 0x3bc   : > { %v530_v32 = vpop.permute.xlu0 %529 }
 0x3bd   : > { %v533_v35 = vsel %vm294_vm5, %v530_v32, %v532_v25  ;;  %v534_v36 = vsel %vm294_vm5, %v532_v25, %v530_v32 }
 0x3be   : > { %v535_v37 = vsel %vm1225_vm6, %v533_v35, %v528_v34  ;;  %v536_v38 = vsel %vm1216_vm4, %v534_v36, %v527_v33  ;;  %v537_v39 = vsel %vm1229_vm7, %v528_v34, %v533_v35  ;;  %v538_v40 = vsel %vm1233_vm8, %v527_v33, %v534_v36 }
 0x3bf   : > { %539 = vst [vmem:[#allocation2] sm:$0xf] %v535_v37  ;;  %540 = vst [vmem:[#allocation2 + $0x8] sm:$0xf] %v536_v38 }
 0x3c0   : > { %549 = vst [vmem:[#allocation2 + $0x30] sm:$0xf] %v537_v39  ;;  %550 = vst [vmem:[#allocation2 + $0x38] sm:$0xf] %v538_v40  ;;  %v592_v42 = vpop.permute.xlu0 %591 }
 0x3c1   : > { %v595_v45 = vsel %vm294_vm5, %v592_v42, %v594_v41  ;;  %v596_v46 = vsel %vm294_vm5, %v594_v41, %v592_v42 }
 0x3c2   : > { %v597_v47 = vsel %vm1225_vm6, %v595_v45, %v590_v44  ;;  %v598_v48 = vsel %vm1216_vm4, %v596_v46, %v589_v43  ;;  %v599_v49 = vsel %vm1229_vm7, %v590_v44, %v595_v45  ;;  %v600_v50 = vsel %vm1233_vm8, %v589_v43, %v596_v46 }
 0x3c3   : > { %601 = vst [vmem:[#allocation2 + $0x10] sm:$0xf] %v597_v47  ;;  %602 = vst [vmem:[#allocation2 + $0x18] sm:$0xf] %v598_v48 }
 0x3c4   : > { %611 = vst [vmem:[#allocation2 + $0x40] sm:$0xf] %v599_v49  ;;  %612 = vst [vmem:[#allocation2 + $0x48] sm:$0xf] %v600_v50 }
 0x3c6   : > { %v615_v51 = vld [vmem:[#allocation2 + $0x8] sm:$0xff]  ;;  %v614_v52 = vld [vmem:[#allocation2] sm:$0xff] }
 0x3c7   : > { %v621_v54 = vld [vmem:[#allocation2 + $0x38] sm:$0xff]  ;;  %v620_v57 = vld [vmem:[#allocation2 + $0x30] sm:$0xff] }
 0x3c8   : > { %v859_v23 = vpack.c.bf16 %v621_v54, %v619_v56  ;;  %v861_v28 = vpack.c.bf16 %v620_v57, %v618_v27 }
 0x3ca   : > { %v617_v3 = vld [vmem:[#allocation2 + $0x18] sm:$0xff]  ;;  %v616_v53 = vld [vmem:[#allocation2 + $0x10] sm:$0xff] }
 0x3cb   : > { %v855_v26 = vpack.c.bf16 %v617_v3, %v615_v51  ;;  %v857_v55 = vpack.c.bf16 %v616_v53, %v614_v52  ;;  %v623_v58 = vld [vmem:[#allocation2 + $0x48] sm:$0xf]  ;;  %v622_v60 = vld [vmem:[#allocation2 + $0x40] sm:$0xf] }
 0x3cd   : > { %856 = vmatprep.subr.bf16.mxu1 %v855_v26 }
 0x3ce   : > { %858 = vmatpush1.bf16.msra.mxu1 %v857_v55 }
 0x3cf   : > { %860 = vmatprep.subr.bf16.mxu1 %v859_v23 }
 0x3d1   : > { %v628_v61 = vpop.permute.xlu0 %627 }
 0x3d2   : > { %862 = vmatpush1.bf16.msra.mxu1 %v861_v28 }
 0x3d3   : > { %837 = vmatprep.subr.msk.mxu1 %vm404_vm9, %v623_v58 }
 0x3d6   : > { %838 = vmatpush1.msk.msra.mxu1 %vm404_vm9, %v622_v60 }
 0x3d7   : > { %839 = vmatmul.mubr.msk.f32.vlgmr.msra.gmra.mrb[0].mxu1 %vm400_vm10, %v613_v59 }
 0x4aa   : > { %v705_v62 = vpop.f32.mrb[0].mxu1 }
 0x4ab   : > { %v706_v63 = vadd.f32 %v705_v62, %v628_v61  ;;  %v707_v1 = vpop.f32.mrb[1].mxu1 }
 0x4ac   : > { %v708_v2 = vadd.f32 %v707_v1, %v628_v61 }
 0x4ad   : > { %v710_v5 = vsel %vm404_vm9, %v706_v63, 0.0  ;;  %v715_v6 = vmul.f32 %v706_v63, %v706_v63 }
 0x4ae   : > { %v711_v7 = vsel %vm404_vm9, %v708_v2, 0.0  ;;  %v716_v8 = vmul.f32 %v708_v2, %v708_v2 }
 0x4af   : > { %v712_v9 = vadd.f32 %v711_v7, %v710_v5  ;;  %v717_v10 = vsel %vm404_vm9, %v715_v6, 0.0 }
 0x4b0   : > { %v718_v4 = vsel %vm404_vm9, %v716_v8, 0.0 }
 0x4b1   : > { %713 = vadd.xlane.f32.xlu1 %v712_v9  ;;  %v719_v11 = vadd.f32 %v718_v4, %v717_v10 }
 0x4b3   : > { %720 = vadd.xlane.f32.xlu0 %v719_v11 }
 0x53e   : > { %v714_v12 = vpop.xlane.xlu1 %713 }
 0x53f   : > { %v722_v13 = vmul.f32 0.00390625, %v714_v12 }
 0x540   : > { %v721_v14 = vpop.xlane.xlu0 %720 }
 0x541   : > { %v723_v15 = vmul.f32 0.00390625, %v721_v14  ;;  %v724_v16 = vmul.f32 %v722_v13, %v722_v13  ;;  %v727_v20 = vsub.f32 %v706_v63, %v722_v13  ;;  %v728_v21 = vsub.f32 %v708_v2, %v722_v13 }
 0x543   : > { %v725_v17 = vsub.f32 %v723_v15, %v724_v16 }
 0x545   : > { %v726_v18 = vmax.f32 %v725_v17, 0.0 }
 0x547   : > { %v729_v19 = vadd.f32 1e-05, %v726_v18 }
 0x549   : > { %919 = vrsqrt.f32 %v729_v19 }
 0x553   : > { %v920_v22 = vpop.eup %919 }
 0x554   : > { %v731_v24 = vmul.f32 %v920_v22, %v727_v20  ;;  %v732_v25 = vmul.f32 %v920_v22, %v728_v21 }
 0x556   : > { %v736_v29 = vcombine.low %v731_v24, %v732_v25 }
 0x558   : > { %v738_v30 = vadd.f32 %v736_v29, %v1172_v0 }
 0x55a   : > { %739 = vst [vmem:[%s240_s15] sm:$0xff] %v738_v30 }
 0x55b   : > { %964 = shalt.err (!%p961_p4)
}
 0x55c   : > { %s965_s13 = scalar_lea.hbm %s1394_s16, 128  ;;  %s969_s9 = scalar_lea.hbm %s1443_s5, 256 }
 0x55d   : > { %p966_p5 = scmp.ne.s32.totalorder %s1394_s16, %s965_s13  ;;  %p970_p0 = scmp.lt.u32.totalorder %s1394_s16, %s1443_s5 }
 0x55e   : > { %p971_p1 = scmp.lt.u32.totalorder %s969_s9, %s965_s13  ;;  %p973_p6 = scmp.lt.u32.totalorder %s965_s13, %s1394_s16 }
 0x55f   : > { %p967_p8 = pnand %p966_p5, %p1460_p11 }
 0x560   : > { %p972_p3 = por %p971_p1, %p970_p0 }
 0x561   : > { %p968_p9 = pneg %p967_p8 }
 0x562   : > { %p974_p12 = por %p973_p6, %p972_p3 }
 0x564   : > { %p975_p13 = pnand %p974_p12, %p968_p9 }
 0x566   : > { %978 = shalt.err (!%p975_p13)
}
 0x567   : > { %865 = dma.vmem_to_hbm [thread:$0]  (%p1460_p11), %s1396_s12, 128, %s1394_s16, %s741_s25  }
 0x568 PF: > { %s767_s23 = sand.u32 1, %s1005_s18   ;;  %p1461_p7 = scmp.ne.s32.totalorder %s1448_s6, 0 }
 0x569   : > { %p1462_p10 = scmp.ge.s32.totalorder %s1017_s21, 2  ;;  %s768_s15 = scalar_lea.sflag [#allocation5], %s767_s23 }
 0x56b   : > { %p872_p2 = pnand %p1462_p10, %p1461_p7 }
 0x56d   : > { %1000 = dma.done.wait (!%p872_p2), %s768_s15, 128  }
 0x56e   : > { %1002 = vsyncadd (!%p872_p2), %s768_s15, 4294967168  ;;  %p18_p4 = scmp.ge.s32.totalorder %s1082_s24, 4   ;;  %s1463_s18 = smov %s1009_s19 }
 0x56f   : > { %s1464_s19 = smov %s1013_s20  ;;  %s1465_s20 = smov %s1094_s27 }
 0x570   : > { %s1466_s21 = smov %s1082_s24  ;;  %20 = sbr.rel (!%p18_p4) target bundleno = 5 (0x5), region = 85 }
 0x577   :  { %773 = vsyncpa [#allocation4], 1 }
 0x578   :  { %775 = vsyncpa [#allocation4 + $0x1], 1 }
 0x579   :  { %776 = vsyncpa [#allocation5], 1 }
 0x57a   :  { %778 = vsyncpa [#allocation5 + $0x1], 1 }

</bundles_post_ra>
